<compile_context>
chip_gen: v6e
topology: v6e:2x2x1
jax: 0.10.0
libtpu: 0.0.40
codegen_flags: <defaults>
</compile_context>

<pallas_src>
import functools

import jax
import jax.numpy as jnp
import numpy as np
from jax.experimental import pallas as pl
from jax.experimental.pallas import tpu as pltpu

_TARGET_BLOCK_BYTES = 2 * 1024 * 1024   # ~2 MiB per input block per array
_NEG_SENTINEL = -1e4                    # BCE(-1e4, 0) == 0.0 exactly in f32


def _bce_elementwise(x, t):
    x = x.astype(jnp.float32)
    t = t.astype(jnp.float32)
    return jnp.maximum(x, 0.0) - x * t + jnp.log1p(jnp.exp(-jnp.abs(x)))


# ---------------------------------------------------------------------------
# mean / sum reduction kernel
# ---------------------------------------------------------------------------
def _bce_sum_kernel(x_ref, t_ref, out_ref, acc_ref, *, tile_m, valid_rows,
                    needs_mask):
    p = pl.program_id(0)                 # parallel part (megacore on v7x)
    i = pl.program_id(1)                 # reduction step within the part
    steps_per_part = pl.num_programs(1)

    @pl.when(i == 0)
    def _init():
        acc_ref[...] = jnp.zeros_like(acc_ref)

    loss = _bce_elementwise(x_ref[...], t_ref[...])

    if not needs_mask:
        # Every tile is fully in-bounds: mask-free hot loop.
        acc_ref[...] += jnp.sum(loss, axis=0, keepdims=True)
    else:
        start = (p * steps_per_part + i) * tile_m
        is_full = start + tile_m <= valid_rows

        @pl.when(is_full)
        def _add_full():
            acc_ref[...] += jnp.sum(loss, axis=0, keepdims=True)

        @pl.when(jnp.logical_not(is_full))
        def _add_masked():
            # Ragged last tile (or phantom tail tile of the last part): mask
            # rows outside the real array.  Runs on at most two tiles total.
            row = start + jax.lax.broadcasted_iota(jnp.int32, loss.shape, 0)
            masked = jnp.where(row < valid_rows, loss, 0.0)
            acc_ref[...] += jnp.sum(masked, axis=0, keepdims=True)

    @pl.when(i == steps_per_part - 1)
    def _finish():
        out_ref[...] = acc_ref[...].reshape(out_ref.shape)


# ---------------------------------------------------------------------------
# reduction='none' kernel (pure elementwise, output written pre-permuted)
# ---------------------------------------------------------------------------
def _bce_none_kernel(x_ref, t_ref, o_ref):
    o_ref[...] = _bce_elementwise(x_ref[...], t_ref[...])


def _flatten_lane_dense(x, t):
    """Flatten both arrays to a lane-dense (rows, K) slab with K % 128 == 0."""
    n = x.size
    x1 = x.reshape(-1)
    t1 = t.reshape(-1)
    k = None
    for cand in (1024, 512, 256, 128):
        if n % cand == 0:
            k = cand
            break
    if k is None:
        # Rare ragged case: pad with values whose BCE contribution is exactly 0
        # so no in-kernel lane mask is needed (costs one pad copy only here).
        k = 512
        pad = (-n) % k
        x1 = jnp.pad(x1, (0, pad), constant_values=_NEG_SENTINEL)
        t1 = jnp.pad(t1, (0, pad), constant_values=0.0)
    rows = x1.size // k
    return x1.reshape(rows, k), t1.reshape(rows, k), rows, k


@functools.partial(jax.jit, static_argnames=("reduction",))
def multi_binary_bce_loss(predictions, targets, reduction="mean"):
    """Pallas equivalent of MultiBinaryBCELoss.forward (NCHW logits/targets)."""
    assert predictions.shape == targets.shape
    B, C, H, W = predictions.shape
    n_elems = B * C * H * W

    if reduction in ("mean", "sum"):
        x2, t2, rows, k = _flatten_lane_dense(predictions, targets)

        tile_m = max(8, (_TARGET_BLOCK_BYTES // (4 * k)) // 8 * 8)
        tile_m = min(tile_m, rows)
        nsteps = pl.cdiv(rows, tile_m)
        parts = 2 if nsteps >= 2 else 1            # lets v7x use both TCs
        steps_per_part = pl.cdiv(nsteps, parts)
        # Masking is only compiled in if a ragged last tile or a phantom tail
        # tile of the last part can exist.
        needs_mask = (rows % tile_m != 0) or (parts * steps_per_part != nsteps)

        def in_map(p, i):
            # Clamp so a phantom tail step of the last part re-reads a valid
            # block; its contribution is fully masked inside the kernel.
            return (jnp.minimum(p * steps_per_part + i, nsteps - 1), 0)

        kernel = functools.partial(_bce_sum_kernel, tile_m=tile_m,
                                   valid_rows=rows, needs_mask=needs_mask)

        partials = pl.pallas_call(
            kernel,
            out_shape=jax.ShapeDtypeStruct((parts, 1, k), jnp.float32),
            grid=(parts, steps_per_part),
            in_specs=[
                pl.BlockSpec((tile_m, k), in_map),
                pl.BlockSpec((tile_m, k), in_map),
            ],
            out_specs=pl.BlockSpec((1, 1, k), lambda p, i: (p, 0, 0)),
            scratch_shapes=[pltpu.VMEM((1, k), jnp.float32)],
            compiler_params=pltpu.CompilerParams(
                dimension_semantics=("parallel", "arbitrary")),
        )(x2, t2)

        total = jnp.sum(partials)               # tiny (parts, 1, k) reduce
        if reduction == "mean":
            return total / jnp.float32(n_elems)
        return total

    elif reduction == "none":
        hw = H * W
        if hw % 128 == 0:
            r, last = hw // 128, 128                # lane-dense view of H*W
            x4 = predictions.reshape(B, C, r, last)
            t4 = targets.reshape(B, C, r, last)
            tile_r = r if r <= 2048 else 2048       # cap block at ~1 MiB/array
        else:
            # Fallback layout (last dim < 128 => masked partial stores, but
            # still correct; only hit for odd spatial sizes).
            r, last = H, W
            x4, t4 = predictions, targets
            tile_r = r

        out = pl.pallas_call(
            _bce_none_kernel,
            out_shape=jax.ShapeDtypeStruct((C, B, r, last), jnp.float32),
            grid=(C, B, pl.cdiv(r, tile_r)),
            in_specs=[
                pl.BlockSpec((1, 1, tile_r, last), lambda c, b, j: (b, c, j, 0)),
                pl.BlockSpec((1, 1, tile_r, last), lambda c, b, j: (b, c, j, 0)),
            ],
            # output written pre-permuted to (C, B, ...) => no XLA transpose
            out_specs=pl.BlockSpec((1, 1, tile_r, last),
                                   lambda c, b, j: (c, b, j, 0)),
            compiler_params=pltpu.CompilerParams(
                dimension_semantics=("parallel", "parallel", "parallel")),
        )(x4, t4)
        # contiguous reshape only (no transpose): (C, B, r, last) -> (C, B, H, W)
        return out.reshape(C, B, H, W)

    else:
        raise ValueError(f"unknown reduction {reduction!r}")


def _reference(predictions, targets, reduction="mean"):
    loss = _bce_elementwise(predictions, targets)   # (B, C, H, W)
    if reduction == "mean":
        return jnp.mean(loss)
    if reduction == "sum":
        return jnp.sum(loss)
    return jnp.transpose(loss, (1, 0, 2, 3))        # torch.stack -> (C, B, H, W)


if __name__ == "__main__":
    # MultiBinaryBCELoss has no learnable parameters.
    B, C, H, W = 2, 4, 16, 16   # num_classes = C = 4
    key = jax.random.PRNGKey(0)
    k1, k2 = jax.random.split(key)
    predictions = jax.random.normal(k1, (B, C, H, W), dtype=jnp.float32) * 2.0
    targets = (jax.random.uniform(k2, (B, C, H, W)) > 0.5).astype(jnp.float32)

    out_mean = jax.block_until_ready(
        multi_binary_bce_loss(predictions, targets, reduction="mean"))
    out_sum = jax.block_until_ready(
        multi_binary_bce_loss(predictions, targets, reduction="sum"))
    out_none = jax.block_until_ready(
        multi_binary_bce_loss(predictions, targets, reduction="none"))

    np.testing.assert_allclose(
        np.asarray(out_mean), np.asarray(_reference(predictions, targets, "mean")),
        rtol=1e-5, atol=1e-5)
    np.testing.assert_allclose(
        np.asarray(out_sum), np.asarray(_reference(predictions, targets, "sum")),
        rtol=1e-5, atol=1e-4)
    np.testing.assert_allclose(
        np.asarray(out_none), np.asarray(_reference(predictions, targets, "none")),
        rtol=1e-5, atol=1e-5)

    print("KERNEL_OK")
</pallas_src>

<mosaic_0001>
module attributes {stable_mosaic.version = 11 : i64} {
  func.func @_bce_sum_kernel(%arg0: i32, %arg1: i32, %arg2: memref<2x1024xf32, #tpu.memory_space<vmem>>, %arg3: memref<2x1024xf32, #tpu.memory_space<vmem>>, %arg4: memref<1x1x1024xf32, #tpu.memory_space<vmem>>, %arg5: memref<1x1024xf32, #tpu.memory_space<vmem>>) attributes {dimension_semantics = [#tpu.dimension_semantics<parallel>, #tpu.dimension_semantics<arbitrary>], iteration_bounds = array<i64: 1, 1>, scalar_prefetch = 0 : i64, scratch_operands = 1 : i64, tpu.core_type = #tpu.core_type<tc>, window_params = [{transform_indices = @transform_0, window_bounds = array<i64: 2, 1024>}, {transform_indices = @transform_1, window_bounds = array<i64: 2, 1024>}, {transform_indices = @transform_2, window_bounds = array<i64: 1, 1, 1024>}]} {
    %c0_i32 = arith.constant 0 : i32
    %0 = arith.cmpi eq, %arg1, %c0_i32 : i32
    %1 = arith.extui %0 : i1 to i32
    %c0_i32_0 = arith.constant 0 : i32
    %2 = arith.cmpi ne, %1, %c0_i32_0 : i32
    scf.if %2 {
      %cst_12 = arith.constant 0.000000e+00 : f32
      %23 = vector.broadcast %cst_12 : f32 to vector<1x1024xf32>
      %c0_13 = arith.constant 0 : index
      %c0_14 = arith.constant 0 : index
      %24 = vector.load %arg5[%c0_13, %c0_14] : memref<1x1024xf32, #tpu.memory_space<vmem>>, vector<1x1024xf32>
      tpu.vector_store %arg5[%c0_13, %c0_14], %23 {strides = array<i32>} : memref<1x1024xf32, #tpu.memory_space<vmem>>, vector<1x1024xf32>,
    } else {
    }
    %c0 = arith.constant 0 : index
    %c0_1 = arith.constant 0 : index
    %3 = vector.load %arg2[%c0, %c0_1] : memref<2x1024xf32, #tpu.memory_space<vmem>>, vector<2x1024xf32>
    %c0_2 = arith.constant 0 : index
    %c0_3 = arith.constant 0 : index
    %4 = vector.load %arg3[%c0_2, %c0_3] : memref<2x1024xf32, #tpu.memory_space<vmem>>, vector<2x1024xf32>
    %cst = arith.constant 0.000000e+00 : f32
    %5 = vector.broadcast %cst : f32 to vector<2x1024xf32>
    %6 = arith.maximumf %3, %5 : vector<2x1024xf32>
    %7 = arith.mulf %3, %4 : vector<2x1024xf32>
    %8 = arith.subf %6, %7 : vector<2x1024xf32>
    %9 = math.absf %3 : vector<2x1024xf32>
    %cst_4 = arith.constant 0.000000e+00 : f32
    %10 = vector.broadcast %cst_4 : f32 to vector<2x1024xf32>
    %11 = arith.subf %10, %9 : vector<2x1024xf32>
    %12 = math.exp %11 : vector<2x1024xf32>
    %13 = math.log1p %12 : vector<2x1024xf32>
    %14 = arith.addf %8, %13 : vector<2x1024xf32>
    %c0_5 = arith.constant 0 : index
    %c0_6 = arith.constant 0 : index
    %15 = vector.load %arg5[%c0_5, %c0_6] : memref<1x1024xf32, #tpu.memory_space<vmem>>, vector<1x1024xf32>
    %cst_7 = arith.constant dense<0.000000e+00> : vector<1024xf32>
    %16 = vector.multi_reduction <add>, %14, %cst_7 [0] : vector<2x1024xf32> to vector<1024xf32>
    %17 = vector.shape_cast %16 : vector<1024xf32> to vector<1x1024xf32>
    %18 = arith.addf %15, %17 : vector<1x1024xf32>
    %c0_8 = arith.constant 0 : index
    %c0_9 = arith.constant 0 : index
    %19 = vector.load %arg5[%c0_8, %c0_9] : memref<1x1024xf32, #tpu.memory_space<vmem>>, vector<1x1024xf32>
    tpu.vector_store %arg5[%c0_8, %c0_9], %18 {strides = array<i32>} : memref<1x1024xf32, #tpu.memory_space<vmem>>, vector<1x1024xf32>,
    %c0_i32_10 = arith.constant 0 : i32
    %20 = arith.cmpi eq, %arg1, %c0_i32_10 : i32
    %21 = arith.extui %20 : i1 to i32
    %c0_i32_11 = arith.constant 0 : i32
    %22 = arith.cmpi ne, %21, %c0_i32_11 : i32
    scf.if %22 {
      %c0_12 = arith.constant 0 : index
      %c0_13 = arith.constant 0 : index
      %23 = vector.load %arg5[%c0_12, %c0_13] : memref<1x1024xf32, #tpu.memory_space<vmem>>, vector<1x1024xf32>
      %24 = vector.shape_cast %23 : vector<1x1024xf32> to vector<1x1x1024xf32>
      %c0_14 = arith.constant 0 : index
      %c0_15 = arith.constant 0 : index
      %c0_16 = arith.constant 0 : index
      %25 = vector.load %arg4[%c0_14, %c0_15, %c0_16] : memref<1x1x1024xf32, #tpu.memory_space<vmem>>, vector<1x1x1024xf32>
      tpu.vector_store %arg4[%c0_14, %c0_15, %c0_16], %24 {strides = array<i32>} : memref<1x1x1024xf32, #tpu.memory_space<vmem>>, vector<1x1x1024xf32>,
    } else {
    }
    return
  }
  func.func @transform_0(%arg0: i32, %arg1: i32) -> (i32, i32) {
    %c1_i32 = arith.constant 1 : i32
    %0 = arith.muli %arg0, %c1_i32 : i32
    %1 = arith.addi %0, %arg1 : i32
    %c0_i32 = arith.constant 0 : i32
    %2 = arith.minsi %1, %c0_i32 : i32
    %c0_i32_0 = arith.constant 0 : i32
    %c0_i32_1 = arith.constant 0 : i32
    return %2, %c0_i32_0 : i32, i32
  }
  func.func @transform_1(%arg0: i32, %arg1: i32) -> (i32, i32) {
    %c1_i32 = arith.constant 1 : i32
    %0 = arith.muli %arg0, %c1_i32 : i32
    %1 = arith.addi %0, %arg1 : i32
    %c0_i32 = arith.constant 0 : i32
    %2 = arith.minsi %1, %c0_i32 : i32
    %c0_i32_0 = arith.constant 0 : i32
    %c0_i32_1 = arith.constant 0 : i32
    return %2, %c0_i32_0 : i32, i32
  }
  func.func @transform_2(%arg0: i32, %arg1: i32) -> (i32, i32, i32) {
    %c0_i32 = arith.constant 0 : i32
    %c0_i32_0 = arith.constant 0 : i32
    %c0_i32_1 = arith.constant 0 : i32
    return %arg0, %c0_i32, %c0_i32_0 : i32, i32, i32
  }
}

</mosaic_0001>

<bundles_post_ra>
// kernel: multi_binary_bce_loss.1
= control target key start
LH: loop header
LB: loop body
LE: loop exit
PB: predicated region body
PF: predicated region fallthrough
CT: control target
= control target key end

     0   :  { %v307_v16 = vmov 1983009808   ;;  %v121_v18 = vlaneseq  ;;  %v308_v41 = vmov 1966171168   ;;  %vm159_vm2 = vcmask 1041408   ;;  %s351_s0 = inlined_call_operand.vmem [shape: f32[2,1024], index: 0, kind: input, shape index: {}]   ;;  %s352_s1 = inlined_call_operand.vmem [shape: f32[2,1024], index: 1, kind: input, shape index: {}]   ;;  %s353_s2 = inlined_call_operand.vmem [shape: f32[1,1,1024], index: 2, kind: output, shape index: {}]  }
   0x1   :  { %v76_v0 = vld [vmem:[%s351_s0] sm:$0xff]  ;;  %v77_v1 = vld [vmem:[%s351_s0 + $0x8] sm:$0xff]  ;;  %v119_v17 = vunpack.c.l.s4 %v307_v16  ;;  %v229_v42 = vunpack.c.l.s4 %v308_v41 }
   0x2   :  { %v86_v2 = vand.u32 2147483647, %v76_v0  ;;  %v87_v3 = vand.u32 2147483647, %v77_v1  ;;  %v78_v14 = vld [vmem:[%s352_s1] sm:$0xff]  ;;  %v79_v15 = vld [vmem:[%s352_s1 + $0x8] sm:$0xff] }
   0x3   :  { %v80_v20 = vmax.f32 %v76_v0, 0.0  ;;  %v82_v21 = vmul.f32 %v78_v14, %v76_v0  ;;  %v81_v24 = vmax.f32 %v77_v1, 0.0  ;;  %v83_v25 = vmul.f32 %v79_v15, %v77_v1 }
   0x4   :  { %v88_v4 = vsub.f32 0.0, %v86_v2  ;;  %v89_v5 = vsub.f32 0.0, %v87_v3  ;;  %v120_v27 = vunpack.c.0.s8 %v119_v17  ;;  %v336_v28 = vshrl.u32 %v121_v18, 7 }
   0x5   :  { %v84_v31 = vsub.f32 %v80_v20, %v82_v21  ;;  %v85_v34 = vsub.f32 %v81_v24, %v83_v25  ;;  %v230_v51 = vunpack.c.0.s8 %v229_v42 }
   0x6   :  { %v90_v6 = vmul.f32 1.442695, %v88_v4  ;;  %v92_v7 = vmul.f32 1.442695, %v89_v5  ;;  %v123_v37 = vsub.s32 %v120_v27, %v336_v28 }
   0x8   :  { %299 = vpow2.f32 %v90_v6 }
   0x9   :  { %301 = vpow2.f32 %v92_v7 }
  0x15   :  { %v300_v8 = vpop.eup %299 }
  0x16   :  { %v302_v9 = vpop.eup %301  ;;  %v94_v10 = vadd.f32 1.0, %v300_v8  ;;  %v97_v12 = vmul.f32 -0.5, %v300_v8  ;;  %v100_v22 = vand.u32 2147483647, %v300_v8 }
  0x17   :  { %v103_v11 = vadd.f32 1.0, %v302_v9  ;;  %v106_v13 = vmul.f32 -0.5, %v302_v9  ;;  %v109_v26 = vand.u32 2147483647, %v302_v9 }
  0x18   :  { %303 = vlog2.f32 %v94_v10  ;;  %v98_v19 = vadd.f32 1.0, %v97_v12  ;;  %vm101_vm0 = vcmp.lt.f32.partialorder %v100_v22, 0.0004427343 }
  0x19   :  { %305 = vlog2.f32 %v103_v11  ;;  %v107_v23 = vadd.f32 1.0, %v106_v13  ;;  %vm110_vm1 = vcmp.lt.f32.partialorder %v109_v26, 0.0004427343 }
  0x1a   :  { %v99_v29 = vmul.f32 %v300_v8, %v98_v19 }
  0x1b   :  { %v108_v32 = vmul.f32 %v302_v9, %v107_v23 }
  0x25   :  { %v304_v30 = vpop.eup %303 }
  0x26   :  { %v306_v33 = vpop.eup %305  ;;  %v96_v35 = vmul.f32 0.6931472, %v304_v30 }
  0x27   :  { %v105_v36 = vmul.f32 0.6931472, %v306_v33 }
  0x28   :  { %v102_v38 = vsel %vm101_vm0, %v99_v29, %v96_v35 }
  0x29   :  { %v111_v39 = vsel %vm110_vm1, %v108_v32, %v105_v36  ;;  %v112_v40 = vadd.f32 %v102_v38, %v84_v31 }
  0x2a   :  { %v113_v43 = vadd.f32 %v111_v39, %v85_v34  ;;  %v233_v39 = vsub.s32 %v230_v51, %v336_v28 }
  0x2b   :  { %v117_v44 = vcombine.high %v112_v40, %v112_v40  ;;  %v124_v45 = vrot.slane %v112_v40, %v123_v37 }
  0x2c   :  { %v134_v46 = vcombine.high %v113_v43, %v113_v43  ;;  %v141_v47 = vrot.slane %v113_v43, %v123_v37 }
  0x2d   :  { %v131_v48 = vrot.slane %v117_v44, %v123_v37  ;;  %v132_v49 = vcombine.high %v124_v45, %v124_v45  ;;  %v160_v50 = vsel %vm159_vm2, %v124_v45, 0.0 }
  0x2e   :  { %v148_v52 = vrot.slane %v134_v46, %v123_v37  ;;  %v149_v53 = vcombine.high %v141_v47, %v141_v47  ;;  %v161_v54 = vrot.slane %v160_v50, 4  ;;  %v188_v55 = vsel %vm159_vm2, %v141_v47, 0.0 }
  0x2f   :  { %v133_v56 = vcombine.high %v131_v48, %v131_v48  ;;  %v167_v57 = vsel %vm159_vm2, %v132_v49, 0.0  ;;  %v174_v58 = vsel %vm159_vm2, %v131_v48, 0.0  ;;  %v189_v59 = vrot.slane %v188_v55, 4 }
  0x30   :  { %v150_v60 = vcombine.high %v148_v52, %v148_v52  ;;  %v162_v61 = vadd.f32 %v161_v54, %v160_v50  ;;  %v168_v62 = vrot.slane %v167_v57, 4  ;;  %v175_v63 = vrot.slane %v174_v58, 4 }
  0x31   :  { %v181_v0 = vsel %vm159_vm2, %v133_v56, 0.0  ;;  %v190_v1 = vadd.f32 %v189_v59, %v188_v55  ;;  %v195_v2 = vsel %vm159_vm2, %v149_v53, 0.0  ;;  %v202_v3 = vsel %vm159_vm2, %v148_v52, 0.0 }
  0x32   :  { %v163_v4 = vrot.slane %v162_v61, 2  ;;  %v169_v5 = vadd.f32 %v168_v62, %v167_v57  ;;  %v176_v6 = vadd.f32 %v175_v63, %v174_v58  ;;  %v182_v7 = vrot.slane %v181_v0, 4 }
  0x33   :  { %v191_v8 = vrot.slane %v190_v1, 2  ;;  %v196_v9 = vrot.slane %v195_v2, 4  ;;  %v203_v10 = vrot.slane %v202_v3, 4  ;;  %v209_v11 = vsel %vm159_vm2, %v150_v60, 0.0 }
  0x34   :  { %v164_v12 = vadd.f32 %v163_v4, %v162_v61  ;;  %v170_v13 = vrot.slane %v169_v5, 2  ;;  %v177_v14 = vrot.slane %v176_v6, 2  ;;  %v183_v15 = vadd.f32 %v182_v7, %v181_v0 }
  0x35   :  { %v192_v16 = vadd.f32 %v191_v8, %v190_v1  ;;  %v197_v17 = vadd.f32 %v196_v9, %v195_v2  ;;  %v204_v18 = vadd.f32 %v203_v10, %v202_v3  ;;  %v210_v19 = vrot.slane %v209_v11, 4 }
  0x36   :  { %v165_v20 = vrot.slane %v164_v12, 1  ;;  %v171_v21 = vadd.f32 %v170_v13, %v169_v5  ;;  %v178_v22 = vadd.f32 %v177_v14, %v176_v6  ;;  %v184_v23 = vrot.slane %v183_v15, 2 }
  0x37   :  { %v193_v24 = vrot.slane %v192_v16, 1  ;;  %v198_v25 = vrot.slane %v197_v17, 2  ;;  %v205_v26 = vrot.slane %v204_v18, 2  ;;  %v211_v27 = vadd.f32 %v210_v19, %v209_v11 }
  0x38   :  { %v166_v29 = vadd.f32 %v165_v20, %v164_v12  ;;  %v172_v30 = vrot.slane %v171_v21, 1  ;;  %v179_v31 = vrot.slane %v178_v22, 1  ;;  %v185_v32 = vadd.f32 %v184_v23, %v183_v15 }
  0x39   :  { %v199_v33 = vadd.f32 %v198_v25, %v197_v17  ;;  %v206_v34 = vadd.f32 %v205_v26, %v204_v18  ;;  %v212_v35 = vrot.slane %v211_v27, 2  ;;  %v194_v40 = vadd.f32 %v193_v24, %v192_v16 }
  0x3a   :  { %v173_v36 = vadd.f32 %v172_v30, %v171_v21  ;;  %v180_v37 = vadd.f32 %v179_v31, %v178_v22  ;;  %v186_v38 = vrot.slane %v185_v32, 1 }
  0x3b   :  { %v200_v41 = vrot.slane %v199_v33, 1  ;;  %v207_v42 = vrot.slane %v206_v34, 1  ;;  %v213_v43 = vadd.f32 %v212_v35, %v211_v27 }
  0x3c   :  { %v187_v44 = vadd.f32 %v186_v38, %v185_v32  ;;  %v224_v45 = vcombine.low %v166_v29, %v173_v36 }
  0x3d   :  { %v201_v46 = vadd.f32 %v200_v41, %v199_v33  ;;  %v208_v47 = vadd.f32 %v207_v42, %v206_v34  ;;  %v214_v48 = vrot.slane %v213_v43, 1 }
  0x3e   :  { %v225_v49 = vcombine.low %v180_v37, %v187_v44  ;;  %v234_v50 = vrot.slane %v224_v45, %v233_v39 }
  0x3f   :  { %v215_v52 = vadd.f32 %v214_v48, %v213_v43  ;;  %v226_v53 = vcombine.low %v194_v40, %v201_v46 }
  0x40   :  { %v241_v54 = vrot.slane %v225_v49, %v233_v39 }
  0x41   :  { %v227_v55 = vcombine.low %v208_v47, %v215_v52  ;;  %v248_v56 = vrot.slane %v226_v53, %v233_v39 }
  0x42   :  { %v256_v57 = vcombine.low %v234_v50, %v241_v54 }
  0x43   :  { %v255_v58 = vrot.slane %v227_v55, %v233_v39 }
  0x44   :  { %v264_v28 = vrot.slane %v256_v57, %v233_v39 }
  0x45   :  { %v257_v59 = vcombine.low %v248_v56, %v255_v58 }
  0x47   :  { %v271_v51 = vrot.slane %v257_v59, %v233_v39 }
  0x49   :  { %v272_v60 = vcombine.low %v264_v28, %v271_v51 }
  0x4b   :  { %280 = vst [vmem:[%s353_s2] sm:$0xff] %v272_v60 }

</bundles_post_ra>
